<compile_context>
chip_gen: v7x
topology: tpu7x:2x2x1
jax: 0.10.0
libtpu: 0.0.40
codegen_flags: <defaults>
</compile_context>

<pallas_src>
import jax
import jax.numpy as jnp
from jax.experimental import pallas as pl
from jax.experimental.pallas import tpu as pltpu

_MiB = 1024 * 1024
# Minimum sublane alignment of a (tb, hidden) block per input dtype (f32 / bf16 / int8).
_SUBLANES = {4: 8, 2: 16, 1: 32}

_VMEM_CAP_CACHE = None


def _vmem_capacity_bytes() -> int:
    """Per-TensorCore VMEM capacity; conservative (v7x-sized) fallback on failure."""
    global _VMEM_CAP_CACHE
    if _VMEM_CAP_CACHE is None:
        try:
            _VMEM_CAP_CACHE = int(pltpu.get_tpu_info().vmem_capacity_bytes)
        except Exception:
            _VMEM_CAP_CACHE = 64 * _MiB
    return _VMEM_CAP_CACHE


def _round_up(n: int, m: int) -> int:
    return ((n + m - 1) // m) * m


def _choose_batch_tile(batch: int, hidden: int, dtype_bytes: int,
                       working_budget_bytes: int) -> int:
    """Pick the batch tile.

    Cap by bytes, not rows: the in-kernel working set per tile row is roughly
    2 double-buffered x rows (native dtype) + up to two f32 temporaries, i.e.
    hidden * (2*dtype_bytes + 8) bytes.  Multi-MiB tiles amortize the ~0.35us
    per-grid-step fixed cost and reach the HBM roofline plateau.
    """
    sub = _SUBLANES.get(dtype_bytes, 8)
    bytes_per_row = hidden * (2 * dtype_bytes + 8)
    max_tb = max(sub, working_budget_bytes // bytes_per_row)
    if max_tb >= 128:
        max_tb = (max_tb // 128) * 128      # lane-aligned rows -> fully dense stores
    else:
        max_tb = max(sub, (max_tb // sub) * sub)

    if batch > max_tb:
        return max_tb                        # many multi-MiB tiles; last one may be partial
    if batch >= 4 * sub:
        # Whole batch fits one tile: still split into >= 2 tiles so both of v7x's
        # TensorCores stream x on the "parallel" batch axis.
        return _round_up(pl.cdiv(batch, 2), sub)
    # Tiny batch: single tile exactly equal to the array (no padding, no boundary block).
    return batch


def _classifier_kernel(x_ref, w_ref, b_ref, o_ref):
    # x_ref: (TB, H) VMEM   w_ref: (1, H) VMEM   b_ref: (1, 1) SMEM   o_ref: (1, 1, TB) VMEM
    x = x_ref[...].astype(jnp.float32)                     # (TB, H)
    w = w_ref[...].astype(jnp.float32)                     # (1, H) broadcast over sublanes
    # Lane-dense VPU multiply + XLU lane reduction (no degenerate 1-wide MXU operand).
    row = jnp.sum(x * w, axis=-1) + b_ref[0, 0]            # (TB,) f32
    # Lane-dense writeback: one (1, TB) row per grid step (XLU relayout, which has slack),
    # instead of TB/8 masked sublane-strided (TB, 1) stores.
    o_ref[0, 0, :] = row.astype(o_ref.dtype)


@jax.jit
def binary_classifier_forward(x: jax.Array, weight: jax.Array, bias: jax.Array) -> jax.Array:
    """Forward pass of BinaryClassifier: returns x @ weight.T + bias, shape (batch, 1).

    x:      (batch, hidden)  f32 / bf16
    weight: (1, hidden)      (PyTorch nn.Linear layout, used as-is — no transpose)
    bias:   (1,)
    """
    batch, hidden = x.shape
    dtype_bytes = jnp.dtype(x.dtype).itemsize

    # Generation-aware VMEM budgets: 128 MiB parts (v5e/v6e) get bigger tiles and a
    # higher scoped-VMEM limit; 64 MiB parts (v7x, per TensorCore) stay conservative.
    if _vmem_capacity_bytes() >= 96 * _MiB:
        working_budget, vmem_limit = 64 * _MiB, 100 * _MiB
    else:
        working_budget, vmem_limit = 32 * _MiB, 48 * _MiB

    tb = _choose_batch_tile(batch, hidden, dtype_bytes, working_budget)
    num_tiles = pl.cdiv(batch, tb)

    w2d = weight.reshape(1, hidden)                 # keep lane-dense (1, hidden)
    b2d = bias.reshape(1, 1).astype(jnp.float32)    # scalar parameter -> SMEM

    # TODO(synk): for extremely large hidden (>~64K) add a second ("arbitrary") grid axis
    # over hidden with a VMEM f32 accumulator instead of shrinking the batch tile.

    out_dtype_bytes = dtype_bytes
    cost = pl.CostEstimate(
        flops=2 * batch * hidden,
        transcendentals=0,
        bytes_accessed=batch * hidden * dtype_bytes            # streamed x (read once, no pad)
        + hidden * jnp.dtype(weight.dtype).itemsize            # resident weight row
        + num_tiles * tb * out_dtype_bytes + 4,                 # lane-dense output + bias
    )

    out = pl.pallas_call(
        _classifier_kernel,
        out_shape=jax.ShapeDtypeStruct((num_tiles, 1, tb), x.dtype),
        grid_spec=pltpu.PrefetchScalarGridSpec(
            num_scalar_prefetch=0,
            grid=(num_tiles,),
            in_specs=[
                pl.BlockSpec((tb, hidden), lambda i: (i, 0)),          # streamed x tiles
                pl.BlockSpec((1, hidden), lambda i: (0, 0)),           # resident weight row
                pl.BlockSpec(memory_space=pltpu.MemorySpace.SMEM),     # bias scalar in SMEM
            ],
            out_specs=pl.BlockSpec((1, 1, tb), lambda i: (i, 0, 0)),   # lane-dense rows
        ),
        compiler_params=pltpu.CompilerParams(
            # "parallel" lets the compiler shard batch tiles across v7x's two TensorCores.
            dimension_semantics=("parallel",),
            vmem_limit_bytes=vmem_limit,
        ),
        cost_estimate=cost,
    )(x, w2d, b2d)

    flat = out.reshape(num_tiles * tb, 1)
    return flat if num_tiles * tb == batch else flat[:batch]


def get_hyperplane_normal(weight: jax.Array) -> jax.Array:
    """Equivalent of BinaryClassifier.get_hyperplane_normal (plain JAX glue)."""
    return weight.squeeze(0)


if __name__ == "__main__":
    hidden_dim = 32
    key = jax.random.PRNGKey(0)
    kx, kw, kb, kx2, kx3, kx4 = jax.random.split(key, 6)

    # Deterministic synthetic parameters (same shapes as nn.Linear(hidden_dim, 1)).
    bound = 1.0 / jnp.sqrt(hidden_dim)
    weight = jax.random.uniform(kw, (1, hidden_dim), jnp.float32, -bound, bound)
    bias = jax.random.uniform(kb, (1,), jnp.float32, -bound, bound)

    # Small aligned batch (single full-array tile).
    x = jax.random.normal(kx, (8, hidden_dim), jnp.float32)
    out = jax.block_until_ready(binary_classifier_forward(x, weight, bias))
    ref = x @ weight.T + bias
    assert out.shape == (8, 1)
    assert jnp.allclose(out, ref, atol=1e-5, rtol=1e-5)

    # Ragged small batch (no wrapper-side padding; single full-array tile).
    x_odd = jax.random.normal(kx2, (10, hidden_dim), jnp.float32)
    out_odd = jax.block_until_ready(binary_classifier_forward(x_odd, weight, bias))
    ref_odd = x_odd @ weight.T + bias
    assert out_odd.shape == (10, 1)
    assert jnp.allclose(out_odd, ref_odd, atol=1e-5, rtol=1e-5)

    # Larger ragged batch: exercises the 2-tile split + masked boundary block + flat slice.
    x_big = jax.random.normal(kx3, (300, hidden_dim), jnp.float32)
    out_big = jax.block_until_ready(binary_classifier_forward(x_big, weight, bias))
    ref_big = x_big @ weight.T + bias
    assert out_big.shape == (300, 1)
    assert jnp.allclose(out_big, ref_big, atol=1e-5, rtol=1e-5)

    # bf16 activations: dtype-dependent sublane alignment + f32 in-kernel accumulation.
    x_bf = jax.random.normal(kx4, (70, hidden_dim), jnp.float32).astype(jnp.bfloat16)
    out_bf = jax.block_until_ready(binary_classifier_forward(x_bf, weight, bias))
    ref_bf = x_bf.astype(jnp.float32) @ weight.T + bias
    assert out_bf.shape == (70, 1)
    assert jnp.allclose(out_bf.astype(jnp.float32), ref_bf, atol=3e-2, rtol=3e-2)

    print("KERNEL_OK")
</pallas_src>

<mosaic_0001>
module attributes {stable_mosaic.version = 11 : i64} {
  func.func @_classifier_kernel(%arg0: i32, %arg1: memref<8x32xf32, #tpu.memory_space<vmem>>, %arg2: memref<1x32xf32, #tpu.memory_space<vmem>>, %arg3: memref<1x1xf32, #tpu.memory_space<smem>>, %arg4: memref<1x1x8xf32, #tpu.memory_space<vmem>>) attributes {dimension_semantics = [#tpu.dimension_semantics<parallel>], iteration_bounds = array<i64: 1>, scalar_prefetch = 0 : i64, scratch_operands = 0 : i64, tpu.core_type = #tpu.core_type<tc>, window_params = [{transform_indices = @transform_0, window_bounds = array<i64: 8, 32>}, {pipeline_mode = #tpu.pipeline_mode<synchronous>, transform_indices = @transform_1, window_bounds = array<i64: 1, 32>}, {transform_indices = @transform_2, window_bounds = array<i64: 1, 1>}, {transform_indices = @transform_3, window_bounds = array<i64: 1, 1, 8>}]} {
    %c0 = arith.constant 0 : index
    %c0_0 = arith.constant 0 : index
    %0 = vector.load %arg1[%c0, %c0_0] : memref<8x32xf32, #tpu.memory_space<vmem>>, vector<8x32xf32>
    %c0_1 = arith.constant 0 : index
    %c0_2 = arith.constant 0 : index
    %1 = vector.load %arg2[%c0_1, %c0_2] : memref<1x32xf32, #tpu.memory_space<vmem>>, vector<1x32xf32>
    %2 = vector.broadcast %1 : vector<1x32xf32> to vector<8x32xf32>
    %3 = arith.mulf %0, %2 : vector<8x32xf32>
    %cst = arith.constant dense<0.000000e+00> : vector<8xf32>
    %4 = vector.multi_reduction <add>, %3, %cst [1] : vector<8x32xf32> to vector<8xf32>
    %c0_3 = arith.constant 0 : index
    %c0_4 = arith.constant 0 : index
    %5 = memref.load %arg3[%c0_3, %c0_4] : memref<1x1xf32, #tpu.memory_space<smem>>
    %6 = vector.broadcast %5 : f32 to vector<8xf32>
    %7 = arith.addf %4, %6 : vector<8xf32>
    %c0_5 = arith.constant 0 : index
    %c0_6 = arith.constant 0 : index
    %c0_7 = arith.constant 0 : index
    %8 = vector.load %arg4[%c0_5, %c0_6, %c0_7] : memref<1x1x8xf32, #tpu.memory_space<vmem>>, vector<1x1x8xf32>
    %9 = vector.shape_cast %8 : vector<1x1x8xf32> to vector<8xf32>
    %10 = vector.shape_cast %7 : vector<8xf32> to vector<1x1x8xf32>
    tpu.vector_store %arg4[%c0_5, %c0_6, %c0_7], %10 {strides = array<i32>} : memref<1x1x8xf32, #tpu.memory_space<vmem>>, vector<1x1x8xf32>,
    return
  }
  func.func @transform_0(%arg0: i32) -> (i32, i32) {
    %c0_i32 = arith.constant 0 : i32
    %c0_i32_0 = arith.constant 0 : i32
    return %arg0, %c0_i32 : i32, i32
  }
  func.func @transform_1(%arg0: i32) -> (i32, i32) {
    %c0_i32 = arith.constant 0 : i32
    %c0_i32_0 = arith.constant 0 : i32
    %c0_i32_1 = arith.constant 0 : i32
    return %c0_i32, %c0_i32_0 : i32, i32
  }
  func.func @transform_2(%arg0: i32) -> (i32, i32) {
    %c0_i32 = arith.constant 0 : i32
    %c0_i32_0 = arith.constant 0 : i32
    %c0_i32_1 = arith.constant 0 : i32
    return %c0_i32, %c0_i32_0 : i32, i32
  }
  func.func @transform_3(%arg0: i32) -> (i32, i32, i32) {
    %c0_i32 = arith.constant 0 : i32
    %c0_i32_0 = arith.constant 0 : i32
    %c0_i32_1 = arith.constant 0 : i32
    return %arg0, %c0_i32, %c0_i32_0 : i32, i32, i32
  }
}

</mosaic_0001>

<bundles_post_ra>
// kernel: binary_classifier_forward.1
= control target key start
LH: loop header
LB: loop body
LE: loop exit
PB: predicated region body
PF: predicated region fallthrough
CT: control target
= control target key end

     0   :  { %9 = vsyncpa [#allocation4], 0  ;;  %s172_s0 = inlined_call_operand.hbm [shape: f32[8,32], index: 0, kind: input, shape index: {}]   ;;  %s173_s1 = inlined_call_operand.vmem [shape: f32[1,32], index: 1, kind: input, shape index: {}]   ;;  %s174_s2 = inlined_call_operand.<no memory space> [shape: f32[1,1], index: 2, kind: input, shape index: {}]   ;;  %s175_s3 = inlined_call_operand.hbm [shape: f32[1,1,8], index: 3, kind: output, shape index: {}]  }
   0x1   :  { %10 = vsyncpa [#allocation5], 0  ;;  %s120_s12 = smov [#allocation3]   ;;  %s72_s16 = scalar_lea.hbm %s172_s0, 128 }
   0x2   :  { %s17_s13 = sshll.u32 %s120_s12, 4  ;;  %p73_p0 = scmp.ne.s32.totalorder %s172_s0, %s72_s16  ;;  %s18_s13 = int_to_ptr.vmem [resolvable:$true] %s17_s13 }
   0x3   :  { %p76_p1 = scmp.lt.u32.totalorder %s72_s16, %s172_s0 }
   0x5   :  { %p78_p2 = pnand %p76_p1, %p73_p0 }
   0x7   :  { %81 = shalt.err (!%p78_p2)
}
   0x8   :  { %s82_s21 = scalar_lea.vmem %s18_s13, 128  ;;  %p87_p4 = scmp.lt.s32.totalorder %s18_s13, %s18_s13 }
   0x9   :  { %p83_p3 = scmp.ne.s32.totalorder %s18_s13, %s82_s21  ;;  %p88_p5 = scmp.lt.s32.totalorder %s82_s21, %s82_s21 }
   0xb   :  { %p89_p6 = por %p88_p5, %p87_p4 }
   0xd   :  { %p90_p7 = pnand %p89_p6, %p83_p3 }
   0xf   :  { %93 = shalt.err (!%p90_p7)
}
  0x10   :  { %20 = dma.hbm_to_vmem [thread:$0]  %s172_s0, 128, %s18_s13, [#allocation4]  }
  0x11   :  { %116 = dma.done.wait [#allocation4], 128  }
  0x12   :  { %117 = vsyncadd [#allocation4], 4294967168  ;;  %v28_v0 = vld [vmem:[#allocation3] sm:$0xff]  ;;  %vm37_vm0 = vcmask 261120   ;;  %v45_v4 = vlaneseq  ;;  %v42_v7 = vstv %s174_s2  ;;  %s121_s0 = smov [#allocation6]   ;;  %vm52_vm1 = vcmask 57344  }
  0x13   :  { %v69_v1 = vld [vmem:[%s173_s1] ss:$0 sm:$0xff]  ;;  %s60_s28 = sshll.u32 %s121_s0, 4  ;;  %s61_s28 = int_to_ptr.vmem [resolvable:$true] %s60_s28 }
  0x14   :  { %v36_v2 = vmul.f32 %v69_v1, %v28_v0  ;;  %v46_v5 = vand.u32 127, %v45_v4  ;;  %v48_v6 = vshrl.u32 %v45_v4, 7  ;;  %s94_s1 = scalar_lea.vmem %s61_s28, 16  ;;  %s98_s29 = scalar_lea.vmem %s61_s28, 32 }
  0x15   :  { %p95_p8 = scmp.ne.s32.totalorder %s61_s28, %s94_s1  ;;  %p99_p9 = scmp.lt.s32.totalorder %s61_s28, %s61_s28 }
  0x16   :  { %v38_v3 = vsel %vm37_vm0, %v36_v2, 0.0  ;;  %v49_v8 = vsub.s32 %v46_v5, %v48_v6  ;;  %p100_p10 = scmp.lt.s32.totalorder %s98_s29, %s94_s1 }
  0x17   :  { %39 = vadd.xlane.f32.xlu0 %v38_v3 }
  0x18   :  { %p101_p11 = por %p100_p10, %p99_p9 }
  0x1a   :  { %p102_p12 = pnand %p101_p11, %p95_p8 }
  0xa4   :  { %v40_v9 = vpop.xlane.xlu0 %39 }
  0xa5   :  { %v43_v10 = vadd.f32 %v42_v7, %v40_v9 }
  0xa7   :  { %v50_v11 = vrot.slane %v43_v10, %v49_v8 }
  0xa9   :  { %53 = vst.msk [vmem:[#allocation6] sm:$0x1] %vm52_vm1, %v50_v11 }
  0xaa   :  { %105 = shalt.err (!%p102_p12)
}
  0xab   :  { %s106_s2 = scalar_lea.hbm %s175_s3, 16 }
  0xac   :  { %p107_p13 = scmp.ne.s32.totalorder %s175_s3, %s106_s2  ;;  %p110_p0 = scmp.lt.u32.totalorder %s106_s2, %s175_s3 }
  0xae   :  { %p112_p1 = pnand %p110_p0, %p107_p13 }
  0xb0   :  { %115 = shalt.err (!%p112_p1)
}
  0xb1   :  { %63 = dma.vmem_to_hbm [thread:$0]  %s61_s28, 16, %s175_s3, [#allocation5]  }
  0xb2   :  { %118 = dma.done.wait [#allocation5], 16  }
  0xb3   :  { %119 = vsyncadd [#allocation5], 4294967280 }
  0xb4   :  { %67 = vsyncpa [#allocation4], 1 }
  0xb5   :  { %68 = vsyncpa [#allocation5], 1 }

</bundles_post_ra>
